<compile_context>
chip_gen: v7x
topology: tpu7x:2x2x1
jax: 0.10.0
libtpu: 0.0.40
codegen_flags: <defaults>
</compile_context>

<pallas_src>
import functools

import jax
import jax.numpy as jnp
from jax.experimental import pallas as pl
from jax.experimental.pallas import tpu as pltpu


# ----------------------------- Pallas kernel ------------------------------ #

def _domain_topk_kernel(pred_ref, mtgt_ref, out_ref, acc_c_ref, acc_n_ref, *,
                        topk, num_valid_rows, nblocks, steps_per_core):
    """One batch-tile of the domain-masked top-k accuracy reduction.

    pred_ref : (TB, C)    float   prediction logits
    mtgt_ref : (TB, 1)    int32   target id, or -1 if the row is outside the
                                  domain (mask folded in by the wrapper)
    out_ref  : (1, 8, 128) f32    per-core partials; sublane 0 = correct,
                                  sublane 1 = count (written on last step)
    acc_*    : (TB, 1)    f32     per-row accumulators (persist across steps)
    """
    c = pl.program_id(0)          # core axis ("parallel")
    i = pl.program_id(1)          # batch-tile axis ("arbitrary" reduction)

    @pl.when(i == 0)
    def _init():
        acc_c_ref[...] = jnp.zeros_like(acc_c_ref)
        acc_n_ref[...] = jnp.zeros_like(acc_n_ref)

    p = pred_ref[...]                         # (TB, C)
    t = mtgt_ref[...]                         # (TB, 1) int32, -1 => masked out
    tb, cc = p.shape

    # Logical block index for this (core, step); the index_map clamps the DMA
    # to the last in-bounds block, so duplicate/overhanging rows are masked.
    blk = c * steps_per_core + i
    blk_clamped = jnp.minimum(blk, nblocks - 1)
    row_ids = jax.lax.broadcasted_iota(jnp.int32, (tb, 1), 0) + blk_clamped * tb
    row_valid = (row_ids < num_valid_rows) & (blk < nblocks)     # (TB, 1) bool

    # Domain mask was folded into the label stream: t >= 0 <=> row is in domain.
    dmask = (t >= 0) & row_valid                                 # (TB, 1) bool

    # Target logit via one-hot masked sum (exact: single non-zero per row),
    # then rank = #(logits strictly greater).  (1, C) iota broadcasts against
    # (TB, 1) targets; comparisons stay in the prediction's native dtype and
    # the rank accumulates as int (no f32 casts on the hot (TB, C) path).
    class_ids = jax.lax.broadcasted_iota(jnp.int32, (1, cc), 1)
    tgt_logit = jnp.sum(jnp.where(class_ids == t, p, jnp.zeros((), p.dtype)),
                        axis=-1, keepdims=True)                  # (TB, 1)
    rank = jnp.sum(p > tgt_logit, axis=-1, keepdims=True)        # (TB, 1) int32
    in_topk = rank < topk                                        # (TB, 1) bool
    # TODO(synk): torch.topk tie-breaking can exclude a target that ties with
    # >= topk other logits; this strict-rank test counts it correct instead.

    acc_c_ref[...] += jnp.where(dmask & in_topk, 1.0, 0.0)
    acc_n_ref[...] += jnp.where(dmask, 1.0, 0.0)

    @pl.when(i == pl.num_programs(1) - 1)
    def _finalize():
        correct = jnp.sum(acc_c_ref[...])                        # scalar f32
        count = jnp.sum(acc_n_ref[...])                          # scalar f32
        row = jax.lax.broadcasted_iota(jnp.int32, out_ref.shape, 1)
        out_ref[...] = jnp.where(row == 0, correct,
                                 jnp.where(row == 1, count, 0.0))


# ------------------------------- Wrapper ----------------------------------- #

def instance_domain_accuracy(prediction, target, imids, domain, *, topk=1,
                             max_tile_bytes=8 * 1024 * 1024, num_cores=2):
    """Domain-masked top-k accuracy (percent) via a single Pallas pass."""
    prediction = jax.lax.stop_gradient(prediction)   # torch.no_grad()
    B, C = prediction.shape
    itemsize = jnp.dtype(prediction.dtype).itemsize

    # Sublane granule per dtype width (f32/i32 -> 8, bf16 -> 16, 8-bit -> 32).
    g = max(8, 32 // max(1, itemsize))
    # Largest batch tile (multiple of g) whose prediction slab stays bounded.
    max_rows = max(g, (max_tile_bytes // max(1, C * itemsize)) // g * g)
    tb = min(((B + g - 1) // g) * g, max_rows)

    nblocks = (B + tb - 1) // tb                     # ceil(B / tb), no padding
    nc = max(1, int(num_cores))
    spc = (nblocks + nc - 1) // nc                   # steps per core

    # Fold the domain-membership test into the label stream (O(B*D) wrapper op,
    # trivial next to the (B, C) logit stream it removes two inputs from).
    dom = domain.reshape(-1).astype(jnp.int32)
    in_dom = jnp.any(imids.reshape(B, 1).astype(jnp.int32) == dom[None, :],
                     axis=1)
    mtgt = jnp.where(in_dom, target.reshape(B).astype(jnp.int32),
                     jnp.int32(-1)).reshape(B, 1)

    kernel = functools.partial(_domain_topk_kernel, topk=int(topk),
                               num_valid_rows=B, nblocks=nblocks,
                               steps_per_core=spc)

    def data_map(c, i):
        # Clamp so no DMA window starts fully past the array end; the kernel
        # masks the duplicate / overhanging rows.
        return (jnp.minimum(c * spc + i, nblocks - 1), 0)

    def out_map(c, i):
        return (c, 0, 0)

    # Advisory cost: domain compare lives in the wrapper; domain block no
    # longer counted per grid step.
    bytes_accessed = int(B * C * itemsize + B * 4 + nc * 8 * 128 * 4)
    cost = pl.CostEstimate(flops=int(5 * B * C), transcendentals=0,
                           bytes_accessed=bytes_accessed)

    partials = pl.pallas_call(
        kernel,
        out_shape=jax.ShapeDtypeStruct((nc, 8, 128), jnp.float32),
        grid_spec=pltpu.PrefetchScalarGridSpec(
            num_scalar_prefetch=0,
            grid=(nc, spc),
            in_specs=[
                pl.BlockSpec((tb, C), data_map),   # prediction tile
                pl.BlockSpec((tb, 1), data_map),   # masked-target tile
            ],
            out_specs=pl.BlockSpec((1, 8, 128), out_map),
            scratch_shapes=[pltpu.VMEM((tb, 1), jnp.float32),
                            pltpu.VMEM((tb, 1), jnp.float32)],
        ),
        compiler_params=pltpu.CompilerParams(
            # Core axis splits across TensorCores (v7x); batch axis reduces
            # into resident accumulators.
            dimension_semantics=("parallel", "arbitrary"),
            vmem_limit_bytes=48 * 1024 * 1024,
        ),
        cost_estimate=cost,
    )(prediction, mtgt)

    correct = jnp.sum(partials[:, 0, 0])
    count = jnp.sum(partials[:, 1, 0])
    # TODO(synk): PyTorch returns None when the masked batch is empty; a
    # data-dependent None is untranslatable, so 0.0 is returned instead.
    return jnp.where(count > 0.0, 100.0 * correct / jnp.maximum(count, 1.0),
                     0.0)


# ------------------------------ Module port -------------------------------- #

class InstanceDomainAccuracy:
    """JAX/Pallas port of model/metrics.py::InstanceDomainAccuracy."""

    def __init__(self, domain_cfg, topk=1, evaluate_only_during_validation=False):
        self.topk = topk
        if domain_cfg.get('ranking') is not None:
            # TODO(synk): the ranking branch loads a torch checkpoint from disk
            # (torch.load) and bins it; file I/O has no in-script Pallas
            # equivalent, so only the explicit-domain branch is supported.
            raise NotImplementedError(
                "domain ranking files are not supported in the Pallas port")
        assert len(domain_cfg['domain']) > 0
        self.domain = jnp.asarray(domain_cfg['domain'], dtype=jnp.int32)
        self.evaluate_only_during_validation = evaluate_only_during_validation
        self.training = True

    def train(self, mode=True):
        self.training = mode
        return self

    def eval(self):
        return self.train(False)

    def forward(self, prediction, target, imids):
        if self.evaluate_only_during_validation and self.training:
            # Matches torch: prediction.new(1).fill_(0.0) -> shape (1,),
            # prediction dtype (the kernel path returns a scalar, as torch's
            # 0-dim tensor does).
            return jnp.zeros((1,), dtype=prediction.dtype)
        return instance_domain_accuracy(prediction, target, imids, self.domain,
                                        topk=self.topk)

    __call__ = forward


# --------------------------------- Demo ------------------------------------ #

if __name__ == "__main__":
    key = jax.random.PRNGKey(0)
    k1, k2, k3 = jax.random.split(key, 3)

    B, C = 20, 32          # deliberately not a multiple of 8: exercises the
                           # pad-free partial-block path
    prediction = jax.random.normal(k1, (B, C), dtype=jnp.float32)
    target = jax.random.randint(k2, (B,), 0, C, dtype=jnp.int32)
    imids = jax.random.randint(k3, (B,), 0, 16, dtype=jnp.int32)

    domain_cfg = {'ranking': None, 'domain': [0, 1, 2, 3, 4, 5, 6, 7],
                  'bins': 16}

    def reference(pred, tgt, ids, dom_list, k):
        dom = jnp.asarray(dom_list, dtype=jnp.int32)
        mask = jnp.any(ids[:, None] == dom[None, :], axis=1)
        cnt = jnp.sum(mask.astype(jnp.float32))
        tgt_logit = pred[jnp.arange(pred.shape[0]), tgt]
        rank = jnp.sum((pred > tgt_logit[:, None]).astype(jnp.float32), axis=1)
        correct = jnp.sum(jnp.where(mask & (rank < k), 1.0, 0.0))
        return jnp.where(cnt > 0.0, 100.0 * correct / jnp.maximum(cnt, 1.0),
                         0.0)

    # Single-block path (default tile budget).
    for k in (1, 3):
        metric = InstanceDomainAccuracy(domain_cfg, topk=k).eval()
        out = jax.block_until_ready(metric(prediction, target, imids))
        ref = reference(prediction, target, imids, domain_cfg['domain'], k)
        assert abs(float(out) - float(ref)) < 1e-4, (k, float(out), float(ref))

    # Multi-block / dual-core-style path (tiny tile budget forces several
    # batch tiles, a partial last tile and a clamped duplicate block).
    for k in (1, 3):
        out = jax.block_until_ready(
            instance_domain_accuracy(prediction, target, imids,
                                     jnp.asarray(domain_cfg['domain'],
                                                 dtype=jnp.int32),
                                     topk=k, max_tile_bytes=1024))
        ref = reference(prediction, target, imids, domain_cfg['domain'], k)
        assert abs(float(out) - float(ref)) < 1e-4, (k, float(out), float(ref))

    # evaluate_only_during_validation short-circuit during training.
    metric_v = InstanceDomainAccuracy(domain_cfg, topk=1,
                                      evaluate_only_during_validation=True)
    zero = jax.block_until_ready(metric_v(prediction, target, imids))
    assert zero.shape == (1,) and float(zero[0]) == 0.0

    print("KERNEL_OK")
</pallas_src>

<mosaic_0001>
module attributes {stable_mosaic.version = 11 : i64} {
  func.func @_domain_topk_kernel(%arg0: i32, %arg1: i32, %arg2: memref<24x32xf32, #tpu.memory_space<vmem>>, %arg3: memref<24x1xi32, #tpu.memory_space<vmem>>, %arg4: memref<1x8x128xf32, #tpu.memory_space<vmem>>, %arg5: memref<24x1xf32, #tpu.memory_space<vmem>>, %arg6: memref<24x1xf32, #tpu.memory_space<vmem>>) attributes {dimension_semantics = [#tpu.dimension_semantics<parallel>, #tpu.dimension_semantics<arbitrary>], iteration_bounds = array<i64: 2, 1>, scalar_prefetch = 0 : i64, scratch_operands = 2 : i64, tpu.core_type = #tpu.core_type<tc>, window_params = [{transform_indices = @transform_0, window_bounds = array<i64: 24, 32>}, {transform_indices = @transform_1, window_bounds = array<i64: 24, 1>}, {transform_indices = @transform_2, window_bounds = array<i64: 1, 8, 128>}]} {
    %c0_i32 = arith.constant 0 : i32
    %0 = arith.cmpi eq, %arg1, %c0_i32 : i32
    %1 = arith.extui %0 : i1 to i32
    %c0_i32_0 = arith.constant 0 : i32
    %2 = arith.cmpi ne, %1, %c0_i32_0 : i32
    scf.if %2 {
      %cst_24 = arith.constant 0.000000e+00 : f32
      %51 = vector.broadcast %cst_24 : f32 to vector<24x1xf32>
      %c0_25 = arith.constant 0 : index
      %c0_26 = arith.constant 0 : index
      %52 = vector.load %arg5[%c0_25, %c0_26] : memref<24x1xf32, #tpu.memory_space<vmem>>, vector<24x1xf32>
      tpu.vector_store %arg5[%c0_25, %c0_26], %51 {strides = array<i32>} : memref<24x1xf32, #tpu.memory_space<vmem>>, vector<24x1xf32>,
      %cst_27 = arith.constant 0.000000e+00 : f32
      %53 = vector.broadcast %cst_27 : f32 to vector<24x1xf32>
      %c0_28 = arith.constant 0 : index
      %c0_29 = arith.constant 0 : index
      %54 = vector.load %arg6[%c0_28, %c0_29] : memref<24x1xf32, #tpu.memory_space<vmem>>, vector<24x1xf32>
      tpu.vector_store %arg6[%c0_28, %c0_29], %53 {strides = array<i32>} : memref<24x1xf32, #tpu.memory_space<vmem>>, vector<24x1xf32>,
    } else {
    }
    %c0 = arith.constant 0 : index
    %c0_1 = arith.constant 0 : index
    %3 = vector.load %arg2[%c0, %c0_1] : memref<24x32xf32, #tpu.memory_space<vmem>>, vector<24x32xf32>
    %c0_2 = arith.constant 0 : index
    %c0_3 = arith.constant 0 : index
    %4 = vector.load %arg3[%c0_2, %c0_3] : memref<24x1xi32, #tpu.memory_space<vmem>>, vector<24x1xi32>
    %c1_i32 = arith.constant 1 : i32
    %5 = arith.muli %arg0, %c1_i32 : i32
    %6 = arith.addi %5, %arg1 : i32
    %c0_i32_4 = arith.constant 0 : i32
    %7 = arith.minsi %6, %c0_i32_4 : i32
    %8 = tpu.iota {dimensions = array<i32: 0>} : vector<24x1xi32>
    %c24_i32 = arith.constant 24 : i32
    %9 = arith.muli %7, %c24_i32 : i32
    %10 = vector.broadcast %9 : i32 to vector<24x1xi32>
    %11 = arith.addi %8, %10 : vector<24x1xi32>
    %c20_i32 = arith.constant 20 : i32
    %12 = vector.broadcast %c20_i32 : i32 to vector<24x1xi32>
    %13 = arith.cmpi slt, %11, %12 : vector<24x1xi32>
    %c1_i32_5 = arith.constant 1 : i32
    %14 = arith.cmpi slt, %6, %c1_i32_5 : i32
    %15 = vector.broadcast %14 : i1 to vector<24x1xi1>
    %16 = arith.andi %13, %15 : vector<24x1xi1>
    %c0_i32_6 = arith.constant 0 : i32
    %17 = vector.broadcast %c0_i32_6 : i32 to vector<24x1xi32>
    %18 = arith.cmpi sge, %4, %17 : vector<24x1xi32>
    %19 = arith.andi %18, %16 : vector<24x1xi1>
    %20 = tpu.iota {dimensions = array<i32: 1>} : vector<1x32xi32>
    %21 = vector.broadcast %20 : vector<1x32xi32> to vector<24x32xi32>
    %22 = vector.broadcast %4 : vector<24x1xi32> to vector<24x32xi32>
    %23 = arith.cmpi eq, %21, %22 : vector<24x32xi32>
    %cst = arith.constant 0.000000e+00 : f32
    %24 = vector.broadcast %cst : f32 to vector<24x32xf32>
    %25 = arith.select %23, %3, %24 : vector<24x32xi1>, vector<24x32xf32>
    %cst_7 = arith.constant dense<0.000000e+00> : vector<24xf32>
    %26 = vector.multi_reduction <add>, %25, %cst_7 [1] : vector<24x32xf32> to vector<24xf32>
    %27 = vector.shape_cast %26 : vector<24xf32> to vector<24x1xf32>
    %28 = vector.broadcast %27 : vector<24x1xf32> to vector<24x32xf32>
    %29 = arith.cmpf ogt, %3, %28 : vector<24x32xf32>
    %30 = arith.extui %29 : vector<24x32xi1> to vector<24x32xi32>
    %cst_8 = arith.constant dense<0> : vector<24xi32>
    %31 = vector.multi_reduction <add>, %30, %cst_8 [1] : vector<24x32xi32> to vector<24xi32>
    %32 = vector.shape_cast %31 : vector<24xi32> to vector<24x1xi32>
    %c1_i32_9 = arith.constant 1 : i32
    %33 = vector.broadcast %c1_i32_9 : i32 to vector<24x1xi32>
    %34 = arith.cmpi slt, %32, %33 : vector<24x1xi32>
    %c0_10 = arith.constant 0 : index
    %c0_11 = arith.constant 0 : index
    %35 = vector.load %arg5[%c0_10, %c0_11] : memref<24x1xf32, #tpu.memory_space<vmem>>, vector<24x1xf32>
    %36 = arith.andi %19, %34 : vector<24x1xi1>
    %cst_12 = arith.constant 1.000000e+00 : f32
    %cst_13 = arith.constant 0.000000e+00 : f32
    %37 = vector.broadcast %cst_12 : f32 to vector<24x1xf32>
    %38 = vector.broadcast %cst_13 : f32 to vector<24x1xf32>
    %39 = arith.select %36, %37, %38 : vector<24x1xi1>, vector<24x1xf32>
    %40 = arith.addf %35, %39 : vector<24x1xf32>
    %c0_14 = arith.constant 0 : index
    %c0_15 = arith.constant 0 : index
    %41 = vector.load %arg5[%c0_14, %c0_15] : memref<24x1xf32, #tpu.memory_space<vmem>>, vector<24x1xf32>
    tpu.vector_store %arg5[%c0_14, %c0_15], %40 {strides = array<i32>} : memref<24x1xf32, #tpu.memory_space<vmem>>, vector<24x1xf32>,
    %c0_16 = arith.constant 0 : index
    %c0_17 = arith.constant 0 : index
    %42 = vector.load %arg6[%c0_16, %c0_17] : memref<24x1xf32, #tpu.memory_space<vmem>>, vector<24x1xf32>
    %cst_18 = arith.constant 1.000000e+00 : f32
    %cst_19 = arith.constant 0.000000e+00 : f32
    %43 = vector.broadcast %cst_18 : f32 to vector<24x1xf32>
    %44 = vector.broadcast %cst_19 : f32 to vector<24x1xf32>
    %45 = arith.select %19, %43, %44 : vector<24x1xi1>, vector<24x1xf32>
    %46 = arith.addf %42, %45 : vector<24x1xf32>
    %c0_20 = arith.constant 0 : index
    %c0_21 = arith.constant 0 : index
    %47 = vector.load %arg6[%c0_20, %c0_21] : memref<24x1xf32, #tpu.memory_space<vmem>>, vector<24x1xf32>
    tpu.vector_store %arg6[%c0_20, %c0_21], %46 {strides = array<i32>} : memref<24x1xf32, #tpu.memory_space<vmem>>, vector<24x1xf32>,
    %c0_i32_22 = arith.constant 0 : i32
    %48 = arith.cmpi eq, %arg1, %c0_i32_22 : i32
    %49 = arith.extui %48 : i1 to i32
    %c0_i32_23 = arith.constant 0 : i32
    %50 = arith.cmpi ne, %49, %c0_i32_23 : i32
    scf.if %50 {
      %c0_24 = arith.constant 0 : index
      %c0_25 = arith.constant 0 : index
      %51 = vector.load %arg5[%c0_24, %c0_25] : memref<24x1xf32, #tpu.memory_space<vmem>>, vector<24x1xf32>
      %52 = vector.shape_cast %51 : vector<24x1xf32> to vector<1x24x1xf32>
      %cst_26 = arith.constant dense<0.000000e+00> : vector<1xf32>
      %53 = vector.multi_reduction <add>, %52, %cst_26 [1, 2] : vector<1x24x1xf32> to vector<1xf32>
      %54 = vector.shape_cast %53 : vector<1xf32> to vector<1x1x1xf32>
      %55 = vector.extract %54[0, 0, 0] : f32 from vector<1x1x1xf32>
      %c0_27 = arith.constant 0 : index
      %c0_28 = arith.constant 0 : index
      %56 = vector.load %arg6[%c0_27, %c0_28] : memref<24x1xf32, #tpu.memory_space<vmem>>, vector<24x1xf32>
      %57 = vector.shape_cast %56 : vector<24x1xf32> to vector<1x24x1xf32>
      %cst_29 = arith.constant dense<0.000000e+00> : vector<1xf32>
      %58 = vector.multi_reduction <add>, %57, %cst_29 [1, 2] : vector<1x24x1xf32> to vector<1xf32>
      %59 = vector.shape_cast %58 : vector<1xf32> to vector<1x1x1xf32>
      %60 = vector.extract %59[0, 0, 0] : f32 from vector<1x1x1xf32>
      %61 = tpu.iota {dimensions = array<i32: 1>} : vector<1x8x128xi32>
      %c0_i32_30 = arith.constant 0 : i32
      %62 = vector.broadcast %c0_i32_30 : i32 to vector<1x8x128xi32>
      %63 = arith.cmpi eq, %61, %62 : vector<1x8x128xi32>
      %c1_i32_31 = arith.constant 1 : i32
      %64 = vector.broadcast %c1_i32_31 : i32 to vector<1x8x128xi32>
      %65 = arith.cmpi eq, %61, %64 : vector<1x8x128xi32>
      %cst_32 = arith.constant 0.000000e+00 : f32
      %66 = vector.broadcast %60 : f32 to vector<1x8x128xf32>
      %67 = vector.broadcast %cst_32 : f32 to vector<1x8x128xf32>
      %68 = arith.select %65, %66, %67 : vector<1x8x128xi1>, vector<1x8x128xf32>
      %69 = vector.broadcast %55 : f32 to vector<1x8x128xf32>
      %70 = arith.select %63, %69, %68 : vector<1x8x128xi1>, vector<1x8x128xf32>
      %c0_33 = arith.constant 0 : index
      %c0_34 = arith.constant 0 : index
      %c0_35 = arith.constant 0 : index
      %71 = vector.load %arg4[%c0_33, %c0_34, %c0_35] : memref<1x8x128xf32, #tpu.memory_space<vmem>>, vector<1x8x128xf32>
      tpu.vector_store %arg4[%c0_33, %c0_34, %c0_35], %70 {strides = array<i32>} : memref<1x8x128xf32, #tpu.memory_space<vmem>>, vector<1x8x128xf32>,
    } else {
    }
    return
  }
  func.func @transform_0(%arg0: i32, %arg1: i32) -> (i32, i32) {
    %c1_i32 = arith.constant 1 : i32
    %0 = arith.muli %arg0, %c1_i32 : i32
    %1 = arith.addi %0, %arg1 : i32
    %c0_i32 = arith.constant 0 : i32
    %2 = arith.minsi %1, %c0_i32 : i32
    %c0_i32_0 = arith.constant 0 : i32
    %c0_i32_1 = arith.constant 0 : i32
    return %2, %c0_i32_0 : i32, i32
  }
  func.func @transform_1(%arg0: i32, %arg1: i32) -> (i32, i32) {
    %c1_i32 = arith.constant 1 : i32
    %0 = arith.muli %arg0, %c1_i32 : i32
    %1 = arith.addi %0, %arg1 : i32
    %c0_i32 = arith.constant 0 : i32
    %2 = arith.minsi %1, %c0_i32 : i32
    %c0_i32_0 = arith.constant 0 : i32
    %c0_i32_1 = arith.constant 0 : i32
    return %2, %c0_i32_0 : i32, i32
  }
  func.func @transform_2(%arg0: i32, %arg1: i32) -> (i32, i32, i32) {
    %c0_i32 = arith.constant 0 : i32
    %c0_i32_0 = arith.constant 0 : i32
    %c0_i32_1 = arith.constant 0 : i32
    return %arg0, %c0_i32, %c0_i32_0 : i32, i32, i32
  }
}

</mosaic_0001>

<bundles_post_ra>
// kernel: tpu_custom_call.1
= control target key start
LH: loop header
LB: loop body
LE: loop exit
PB: predicated region body
PF: predicated region fallthrough
CT: control target
= control target key end

     0   :  { %7 = vsyncpa [#allocation5], 0  ;;  %s885_s0 = inlined_call_operand.vmem [shape: f32[20,32], index: 0, kind: input, shape index: {}]   ;;  %s886_s1 = inlined_call_operand.vmem [shape: s32[20,1], index: 1, kind: input, shape index: {}]   ;;  %s887_s2 = inlined_call_operand.hbm [shape: f32[2,8,128], index: 2, kind: output, shape index: {}]  }
   0x1   :  { %9 = vsyncpa [#allocation5 + $0x1], 0  ;;  %s678_s9 = smov 0   ;;  %s680_s10 = smov 0  }
   0x2   :  { %s682_s11 = smov 0   ;;  %s684_s12 = smov 0  }
   0x3   :  { %s686_s13 = smov 0   ;;  %s688_s14 = smov 0  }
   0x4 LB: > { %s505_s15 = sadd.s32 4294967295, %s658_s14   ;;  %s506_s16 = sadd.s32 4294967294, %s658_s14   ;;  %s658_s14 = sphi %s688_s14, %s15_s14   ;;  %s654_s13 = sphi %s686_s13, %s902_s13   ;;  %s650_s12 = sphi %s684_s12, %s901_s12   ;;  %s646_s11 = sphi %s682_s11, %s900_s11   ;;  %s642_s10 = sphi %s680_s10, %s899_s10   ;;  %s638_s9 = sphi %s678_s9, %s898_s9  }
   0x5   : > { %s27_s17 = sadd.s32 1, %s654_s13  ;;  %s98_s18 = sadd.s32 1, %s646_s11 }
   0x6   : > { %p29_p0 = scmp.ge.s32.totalorder %s27_s17, 2  ;;  %p108_p1 = scmp.ne.s32.totalorder %s646_s11, %s642_s10 }
   0x7   : > { %p109_p2 = scmp.eq.s32.totalorder %s505_s15, 1  ;;  %p114_p3 = scmp.ne.s32.totalorder %s642_s10, %s638_s9 }
   0x8   : > { %s904_s17 = smov (%p29_p0, %s27_s17), 0  ;;  %p115_p5 = scmp.eq.s32.totalorder %s506_s16, 1 }
   0x9   : > { %p718_p4 = por %p109_p2, %p108_p1  ;;  %s95_s20 = ssub.s32 %s654_s13, %s904_s17 }
   0xa   : > { %p509_p6 = scmp.ge.s32.totalorder %s658_s14, 1  ;;  %p96_p7 = scmp.eq.s32.totalorder %s95_s20, 0 }
   0xb   : > { %p725_p8 = por %p115_p5, %p114_p3  ;;  %p163_p9 = scmp.lt.s32.totalorder %s658_s14, 3 }
   0xc   : > { %s731_s22 = scalar_select %p96_p7, %s646_s11, %s98_s18  }
   0xd   : > { %p164_p10 = pnand %p509_p6, %p163_p9 }
   0xe   : > { %p197_p11 = scmp.lt.s32.totalorder (!%p164_p10), %s650_s12, 0  ;;  %vm224_vm0 = vcmask (!%p164_p10), 7168   ;;  %v240_v0 = vlaneseq (!%p164_p10)  ;;  %p252_p12 = scmp.lt.s32.totalorder (!%p164_p10), %s650_s12, 1  ;;  %v660_v1 = vmov (!%p164_p10), 0   ;;  %v661_v2 = vmov (!%p164_p10), 0.0  }
   0xf   : > { %167 = sbr.rel (%p164_p10) target bundleno = 708 (0x2c4), region = 28  ;;  %578 = vset.pattern.permute.xlu0 (!%p164_p10), %v660_v1  ;;  %228 = vst.msk [vmem:[#allocation3] sm:$0xff] (!%p164_p10), %vm224_vm0, %v661_v2  ;;  %225 = vst.msk [vmem:[#allocation2] sm:$0xff] (!%p164_p10), %vm224_vm0, %v661_v2  ;;  %579 = vset.pattern.permute.xlu1 (!%p164_p10), %v660_v1  ;;  %vm282_vm14 = vcmask (!%p164_p10), 261120   ;;  %s193_s6 = sand.u32 (!%p164_p10), 1, %s642_s10  }
  0x10   : > { %226 = vst.msk [vmem:[#allocation2 + $0x8] sm:$0xff] (!%p164_p10), %vm224_vm0, %v661_v2  ;;  %227 = vst.msk [vmem:[#allocation2 + $0x10] sm:$0xff] (!%p164_p10), %vm224_vm0, %v661_v2  ;;  %v752_v3 = vshrl.u32 (!%p164_p10), %v240_v0, 7  ;;  %v266_v27 = vand.u32 (!%p164_p10), 127, %v240_v0  ;;  %s510_s7 = sshll.u32 (!%p164_p10), %s193_s6, 3  ;;  %s514_s8 = sshll.u32 (!%p164_p10), %s650_s12, 7 }
  0x11   : > { %229 = vst.msk [vmem:[#allocation3 + $0x8] sm:$0xff] (!%p164_p10), %vm224_vm0, %v661_v2  ;;  %230 = vst.msk [vmem:[#allocation3 + $0x10] sm:$0xff] (!%p164_p10), %vm224_vm0, %v661_v2  ;;  %s195_s16 = scalar_lea.vmem (!%p164_p10), [#allocation4], %s510_s7 }
  0x12   : > { %v242_v4 = vadd.s32 (!%p164_p10), 8, %v752_v3  ;;  %v243_v5 = vadd.s32 (!%p164_p10), 16, %v752_v3  ;;  %s426_s18 = sshll.u32 (!%p164_p10), %s195_s16, 4  ;;  %s840_s18 = int_to_ptr.vmem [resolvable:$true] %s426_s18 }
  0x16   : > { %s198_s23 = scalar_select %p197_p11, %s650_s12, 0  ;;  %v356_v14 = vld [vmem:[#allocation3] sm:$0xff] }
  0x17   : > { %s253_s24 = scalar_select %p252_p12, 1, 0  ;;  %v342_v16 = vld [vmem:[#allocation2 + $0x10] sm:$0xff] }
  0x18   : > { %s199_s25 = smul.u32 3, %s198_s23  ;;  %v357_v17 = vld [vmem:[#allocation3 + $0x8] sm:$0xff]  ;;  %v358_v20 = vld [vmem:[#allocation3 + $0x10] sm:$0xff]  ;;  %s413_s12 = scalar_lea.sflag [#allocation5], %s193_s6 }
  0x19   : > { %s244_s26 = smul.u32 24, %s198_s23  ;;  %v254_v6 = vstv %s253_s24 }
  0x1a   : > { %p200_p13 = scmp.lt.s32.totalorder %s199_s25, 2  ;;  %vm759_vm1 = vcmp.eq.s32.totalorder %v254_v6, 1 }
  0x1b   : > { %v245_v7 = vstv %s244_s26  ;;  %s580_s26 = scalar_lea.vmem %s840_s18, 128 }
  0x1c   : > { %s906_s25 = smov (!%p200_p13, %s199_s25), 2  ;;  %v246_v8 = vadd.s32 %v245_v7, %v752_v3  ;;  %v247_v10 = vadd.s32 %v245_v7, %v242_v4  ;;  %v248_v11 = vadd.s32 %v245_v7, %v243_v5  ;;  %p581_p0 = scmp.ne.s32.totalorder %s840_s18, %s580_s26 }
  0x1d   : > { %s511_s27 = sshll.u32 %s906_s25, 3  ;;  %s838_s25 = scalar_lea.hbm %s887_s2, %s514_s8 }
  0x1e   : > { %vm249_vm2 = vcmp.lt.s32.totalorder %v246_v8, 20  ;;  %vm250_vm3 = vcmp.lt.s32.totalorder %v247_v10, 20  ;;  %vm251_vm4 = vcmp.lt.s32.totalorder %v248_v11, 20  ;;  %s215_s30 = scalar_lea.vmem %s886_s1, %s511_s27  ;;  %s203_s5 = scalar_lea.vmem %s885_s0, %s511_s27 }
  0x1f   : > { %vm256_vm5 = vmand %vm249_vm2, %vm759_vm1  ;;  %v234_v12 = vld [vmem:[%s215_s30] sm:$0xff]  ;;  %v235_v13 = vld [vmem:[%s215_s30 + $0x8] sm:$0xff]  ;;  %p582_p1 = pnand %p581_p0, %p718_p4  ;;  %s662_s27 = smov [#allocation4]  }
  0x20   : > { %vm257_vm6 = vmand %vm250_vm3, %vm759_vm1  ;;  %268 = vperm.xlu0 %578, %v234_v12   ;;  %vm259_vm7 = vcmp.ge.s32.totalorder %v234_v12, 0  ;;  %vm260_vm8 = vcmp.ge.s32.totalorder %v235_v13, 0  ;;  %v236_v15 = vld [vmem:[%s215_s30 + $0x10] sm:$0xff]  ;;  %v231_v28 = vld [vmem:[%s203_s5] sm:$0xff]  ;;  %s584_s28 = sshll.u32 %s662_s27, 4  ;;  %s585_s28 = int_to_ptr.vmem [resolvable:$false] %s584_s28 }
  0x21   : > { %vm258_vm9 = vmand %vm251_vm4, %vm759_vm1  ;;  %274 = vperm.xlu1 %579, %v236_v15   ;;  %vm261_vm11 = vcmp.ge.s32.totalorder %v236_v15, 0  ;;  %v232_v33 = vld [vmem:[%s203_s5 + $0x8] sm:$0xff]  ;;  %v233_v34 = vld [vmem:[%s203_s5 + $0x10] sm:$0xff]  ;;  %p583_p2 = pneg %p582_p1  ;;  %s586_s29 = scalar_lea.vmem %s585_s28, 256 }
  0x22   : > { %vm775_vm10 = vmand %vm259_vm7, %vm256_vm5  ;;  %p587_p3 = scmp.lt.s32.totalorder %s840_s18, %s585_s28  ;;  %p588_p5 = scmp.lt.s32.totalorder %s586_s29, %s580_s26 }
  0x23   : > { %v359_v18 = vsel %vm775_vm10, 1.0, %v661_v2  ;;  %vm782_vm12 = vmand %vm260_vm8, %vm257_vm6 }
  0x24   : > { %v362_v21 = vadd.f32 %v359_v18, %v356_v14  ;;  %v360_v22 = vsel %vm782_vm12, 1.0, %v661_v2  ;;  %vm789_vm13 = vmand %vm261_vm11, %vm258_vm9  ;;  %271 = vperm.xlu0 %578, %v235_v13   ;;  %p589_p6 = por %p588_p5, %p587_p3 }
  0x25   : > { %v363_v24 = vadd.f32 %v360_v22, %v357_v17  ;;  %v361_v25 = vsel %vm789_vm13, 1.0, %v661_v2 }
  0x26   : > { %365 = vst.msk [vmem:[#allocation3] sm:$0xff] %vm224_vm0, %v362_v21  ;;  %v364_v26 = vadd.f32 %v361_v25, %v358_v20  ;;  %v340_v20 = vld [vmem:[#allocation2] sm:$0xff]  ;;  %p590_p7 = pnand %p589_p6, %p583_p2 }
  0x27   : > { %366 = vst.msk [vmem:[#allocation3 + $0x8] sm:$0xff] %vm224_vm0, %v363_v24 }
  0x28   : > { %367 = vst.msk [vmem:[#allocation3 + $0x10] sm:$0xff] %vm224_vm0, %v364_v26 }
  0x2d   : > { %v388_v61 = vld [vmem:[#allocation3] sm:$0xff] }
  0x2e   : > { %v389_v62 = vld [vmem:[#allocation3 + $0x8] sm:$0xff]  ;;  %v391_v0 = vsel %vm224_vm0, %v388_v61, 0.0 }
  0x2f   : > { %v390_v63 = vld [vmem:[#allocation3 + $0x10] sm:$0xff] }
  0x30   : > { %v394_v5 = vsel %vm224_vm0, %v390_v63, 0.0 }
  0x9f   : > { %v269_v29 = vpop.permute.xlu0 %268 }
  0xa0   : > { %vm276_vm15 = vcmp.eq.s32.totalorder %v266_v27, %v269_v29  ;;  %v275_v30 = vpop.permute.xlu1 %274  ;;  %v341_v29 = vld [vmem:[#allocation2 + $0x8] sm:$0xff] }
  0xa1   : > { %v279_v31 = vsel %vm276_vm15, %v231_v28, 0.0  ;;  %vm278_vm1 = vcmp.eq.s32.totalorder %v266_v27, %v275_v30 }
  0xa2   : > { %v283_v32 = vsel %vm282_vm14, %v279_v31, 0.0  ;;  %v281_v37 = vsel %vm278_vm1, %v233_v34, 0.0 }
  0xa3   : > { %v272_v35 = vpop.permute.xlu0 %271  ;;  %284 = vadd.xlane.f32.xlu1 %v283_v32  ;;  %v289_v39 = vsel %vm282_vm14, %v281_v37, 0.0 }
  0xa4   : > { %vm277_vm2 = vcmp.eq.s32.totalorder %v266_v27, %v272_v35 }
  0xa5   : > { %v280_v36 = vsel %vm277_vm2, %v232_v33, 0.0 }
  0xa6   : > { %v286_v38 = vsel %vm282_vm14, %v280_v36, 0.0 }
  0xa7   : > { %287 = vadd.xlane.f32.xlu0 %v286_v38 }
  0xab   : > { %290 = vadd.xlane.f32.xlu0 %v289_v39 }
 0x130   : > { %v285_v40 = vpop.xlane.xlu1 %284 }
 0x131   : > { %vm292_vm3 = vcmp.gt.f32.partialorder %v231_v28, %v285_v40 }
 0x132   : > { %v295_v41 = vsel %vm292_vm3, 1, %v660_v1 }
 0x133   : > { %v298_v42 = vsel %vm282_vm14, %v295_v41, 0 }
 0x134   : > { %v288_v43 = vpop.xlane.xlu0 %287  ;;  %v300_v44 = vshrl.u32 %v298_v42, 16  ;;  %v299_v47 = vand.u32 65535, %v298_v42 }
 0x135   : > { %vm293_vm4 = vcmp.gt.f32.partialorder %v232_v33, %v288_v43 }
 0x136   : > { %v296_v45 = vsel %vm293_vm4, 1, %v660_v1  ;;  %v302_v46 = vcvt.s32.f32 %v300_v44  ;;  %v301_v53 = vcvt.s32.f32 %v299_v47 }
 0x137   : > { %v311_v48 = vsel %vm282_vm14, %v296_v45, 0 }
 0x138   : > { %305 = vadd.xlane.f32.xlu1 %v302_v46  ;;  %v291_v49 = vpop.xlane.xlu0 %290  ;;  %v313_v50 = vshrl.u32 %v311_v48, 16  ;;  %v312_v54 = vand.u32 65535, %v311_v48 }
 0x139   : > { %vm294_vm5 = vcmp.gt.f32.partialorder %v233_v34, %v291_v49 }
 0x13a   : > { %v297_v51 = vsel %vm294_vm5, 1, %v660_v1  ;;  %v315_v52 = vcvt.s32.f32 %v313_v50  ;;  %v314_v57 = vcvt.s32.f32 %v312_v54  ;;  %v392_v1 = vsel %vm224_vm0, %v389_v62, 0.0 }
 0x13b   : > { %v324_v55 = vsel %vm282_vm14, %v297_v51, 0  ;;  %v393_v4 = vadd.f32 %v392_v1, %v391_v0 }
 0x13c   : > { %318 = vadd.xlane.f32.xlu0 %v315_v52  ;;  %303 = vadd.xlane.f32.xlu1 %v301_v53  ;;  %v326_v56 = vshrl.u32 %v324_v55, 16  ;;  %v325_v59 = vand.u32 65535, %v324_v55 }
 0x13d   : > { %v395_v6 = vadd.f32 %v394_v5, %v393_v4 }
 0x13e   : > { %v328_v58 = vcvt.s32.f32 %v326_v56  ;;  %v327_v60 = vcvt.s32.f32 %v325_v59 }
 0x140   : > { %316 = vadd.xlane.f32.xlu0 %v314_v57  ;;  %331 = vadd.xlane.f32.xlu1 %v328_v58 }
 0x144   : > { %329 = vadd.xlane.f32.xlu0 %v327_v60 }
 0x148   : > { %396 = vadd.xlane.f32.xlu0 %v395_v6 }
 0x1c5   : > { %v306_v7 = vpop.xlane.xlu1 %305 }
 0x1c6   : > { %v308_v8 = vcvt.f32.s32 %v306_v7 }
 0x1c8   : > { %v309_v11 = vshll.u32 %v308_v8, 16 }
 0x1c9   : > { %v319_v9 = vpop.xlane.xlu0 %318  ;;  %v304_v10 = vpop.xlane.xlu1 %303 }
 0x1ca   : > { %v321_v12 = vcvt.f32.s32 %v319_v9  ;;  %v307_v13 = vcvt.f32.s32 %v304_v10 }
 0x1cc   : > { %v310_v14 = vadd.s32 %v309_v11, %v307_v13  ;;  %v322_v18 = vshll.u32 %v321_v12, 16 }
 0x1cd   : > { %v317_v15 = vpop.xlane.xlu0 %316  ;;  %v332_v17 = vpop.xlane.xlu1 %331 }
 0x1ce   : > { %vm337_vm6 = vcmp.lt.s32.totalorder %v310_v14, 1  ;;  %v320_v21 = vcvt.f32.s32 %v317_v15  ;;  %v334_v22 = vcvt.f32.s32 %v332_v17 }
 0x1cf   : > { %vm343_vm7 = vmand %vm775_vm10, %vm337_vm6 }
 0x1d0   : > { %v346_v24 = vsel %vm343_vm7, 1.0, %v661_v2  ;;  %v323_v25 = vadd.s32 %v322_v18, %v320_v21  ;;  %v335_v26 = vshll.u32 %v334_v22, 16 }
 0x1d1   : > { %v349_v27 = vadd.f32 %v346_v24, %v340_v20  ;;  %v330_v28 = vpop.xlane.xlu0 %329 }
 0x1d2   : > { %vm338_vm8 = vcmp.lt.s32.totalorder %v323_v25, 1  ;;  %v333_v30 = vcvt.f32.s32 %v330_v28 }
 0x1d3   : > { %353 = vst.msk [vmem:[#allocation2] sm:$0xff] %vm224_vm0, %v349_v27  ;;  %vm344_vm9 = vmand %vm782_vm12, %vm338_vm8  ;;  %vm405_vm12 = vcmp.eq.s32.totalorder %v752_v3, 0 }
 0x1d4   : > { %v347_v31 = vsel %vm344_vm9, 1.0, %v661_v2  ;;  %v336_v32 = vadd.s32 %v335_v26, %v333_v30 }
 0x1d5   : > { %v350_v33 = vadd.f32 %v347_v31, %v341_v29  ;;  %v397_v43 = vpop.xlane.xlu0 %396 }
 0x1d6   : > { %vm339_vm10 = vcmp.lt.s32.totalorder %v336_v32, 1  ;;  %v398_v23 = vrot.slane %v397_v43, 4 }
 0x1d7   : > { %354 = vst.msk [vmem:[#allocation2 + $0x8] sm:$0xff] %vm224_vm0, %v350_v33  ;;  %vm345_vm11 = vmand %vm789_vm13, %vm339_vm10 }
 0x1d8   : > { %v348_v34 = vsel %vm345_vm11, 1.0, %v661_v2  ;;  %v399_v44 = vadd.f32 %v398_v23, %v397_v43 }
 0x1d9   : > { %v351_v35 = vadd.f32 %v348_v34, %v342_v16 }
 0x1da   : > { %v371_v36 = vld [vmem:[#allocation2] sm:$0xff]  ;;  %v400_v2 = vrot.slane %v399_v44, 2 }
 0x1db   : > { %355 = vst.msk [vmem:[#allocation2 + $0x10] sm:$0xff] %vm224_vm0, %v351_v35  ;;  %v374_v38 = vsel %vm224_vm0, %v371_v36, 0.0 }
 0x1dc   : > { %v401_v48 = vadd.f32 %v400_v2, %v399_v44 }
 0x1de   : > { %v372_v37 = vld [vmem:[#allocation2 + $0x8] sm:$0xff]  ;;  %v402_v51 = vrot.slane %v401_v48, 1 }
 0x1df   : > { %v375_v19 = vsel %vm224_vm0, %v372_v37, 0.0 }
 0x1e0   : > { %v376_v40 = vadd.f32 %v375_v19, %v374_v38  ;;  %v403_v54 = vadd.f32 %v402_v51, %v401_v48 }
 0x1e2   : > { %v373_v39 = vld [vmem:[#allocation2 + $0x10] sm:$0xff] }
 0x1e3   : > { %v377_v41 = vsel %vm224_vm0, %v373_v39, 0.0  ;;  %vm406_vm0 = vcmp.eq.s32.totalorder %v752_v3, 1 }
 0x1e4   : > { %v378_v42 = vadd.f32 %v377_v41, %v376_v40 }
 0x1e6   : > { %379 = vadd.xlane.f32.xlu1 %v378_v42 }
 0x273   : > { %v380_v45 = vpop.xlane.xlu1 %379 }
 0x274   : > { %v381_v46 = vrot.slane %v380_v45, 4 }
 0x276   : > { %v382_v47 = vadd.f32 %v381_v46, %v380_v45 }
 0x278   : > { %v383_v49 = vrot.slane %v382_v47, 2 }
 0x27a   : > { %v384_v50 = vadd.f32 %v383_v49, %v382_v47 }
 0x27c   : > { %v385_v52 = vrot.slane %v384_v50, 1 }
 0x27e   : > { %v386_v53 = vadd.f32 %v385_v52, %v384_v50 }
 0x280   : > { %517 = vpush %v386_v53 }
 0x281   : > { %519 = vpush %v403_v54 }
 0x2b1   : > { %s518_s15 = spop %517 }
 0x2b2   : > { %v409_v55 = vstv %s518_s15  ;;  %s520_s20 = spop %519 }
 0x2b3   : > { %v407_v56 = vstv %s520_s20 }
 0x2b4   : > { %v408_v57 = vsel %vm406_vm0, %v407_v56, 0.0 }
 0x2b5   : > { %v410_v58 = vsel %vm405_vm12, %v409_v55, %v408_v57 }
 0x2b6   : > { %411 = vst [vmem:[%s195_s16] sm:$0xff] %v410_v58 }
 0x2b7   : > { %593 = shalt.err (!%p590_p7)
}
 0x2b8   : > { %s594_s30 = scalar_lea.hbm %s838_s25, 128  ;;  %s598_s5 = scalar_lea.hbm %s887_s2, 256 }
 0x2b9   : > { %p595_p9 = scmp.ne.s32.totalorder %s838_s25, %s594_s30  ;;  %p599_p12 = scmp.lt.u32.totalorder %s838_s25, %s887_s2 }
 0x2ba   : > { %p600_p13 = scmp.lt.u32.totalorder %s598_s5, %s594_s30  ;;  %p602_p1 = scmp.lt.u32.totalorder %s594_s30, %s838_s25 }
 0x2bb   : > { %p596_p10 = pnand %p595_p9, %p718_p4 }
 0x2bc   : > { %p601_p0 = por %p600_p13, %p599_p12 }
 0x2bd   : > { %p597_p11 = pneg %p596_p10 }
 0x2be   : > { %p603_p2 = por %p602_p1, %p601_p0 }
 0x2c0   : > { %p604_p3 = pnand %p603_p2, %p597_p11 }
 0x2c2   : > { %607 = shalt.err (!%p604_p3)
}
 0x2c3   : > { %521 = dma.vmem_to_hbm [thread:$0]  (%p718_p4), %s840_s18, 128, %s838_s25, %s413_s12  }
 0x2c4 PF: > { %p527_p5 = scmp.ge.s32.totalorder %s658_s14, 2  ;;  %s438_s8 = sand.u32 1, %s638_s9  }
 0x2c5   : > { %s439_s15 = scalar_lea.sflag [#allocation5], %s438_s8 }
 0x2c6   : > { %p524_p6 = pnand %p527_p5, %p725_p8 }
 0x2c8   : > { %633 = dma.done.wait (!%p524_p6), %s439_s15, 128  }
 0x2c9   : > { %635 = vsyncadd (!%p524_p6), %s439_s15, 4294967168  ;;  %s15_s14 = sadd.s32 1, %s658_s14   ;;  %s898_s9 = smov %s642_s10 }
 0x2ca   : > { %p12_p7 = scmp.ge.s32.totalorder %s15_s14, 4   ;;  %s899_s10 = smov %s646_s11 }
 0x2cb   : > { %s900_s11 = smov %s731_s22  ;;  %s901_s12 = smov %s654_s13 }
 0x2cc   : > { %s902_s13 = smov %s904_s17  ;;  %14 = sbr.rel (!%p12_p7) target bundleno = 4 (0x4), region = 74 }
 0x2d3   :  { %444 = vsyncpa [#allocation5], 1 }
 0x2d4   :  { %446 = vsyncpa [#allocation5 + $0x1], 1 }

</bundles_post_ra>
